<compile_context>
chip_gen: v7x
topology: tpu7x:2x2x1
jax: 0.10.0
libtpu: 0.0.40
codegen_flags: <defaults>
</compile_context>

<pallas_src>
import functools

import jax
import jax.numpy as jnp
from jax.experimental import pallas as pl
from jax.experimental.pallas import tpu as pltpu


def _round_up(x, m):
    return (x + m - 1) // m * m


def _tpu_tile_defaults():
    """(TM_pref, TN_pref, vmem_cap_bytes) -- generation aware, with safe fallbacks."""
    tm, tn = 256, 256
    cap = 64 * 2 ** 20  # conservative fallback (v7x per-TC VMEM)
    try:
        kind = jax.devices()[0].device_kind.lower()
        if "v5 lite" in kind or "v5e" in kind:
            # v5e MXU is 4x128x128; smaller tiles ease the single vst slot / spills.
            tm, tn = 128, 128
    except Exception:
        pass
    try:
        info = pltpu.get_tpu_info()
        for attr in ("vmem_capacity_bytes", "vmem_bytes", "vmem_size_bytes"):
            v = getattr(info, attr, None)
            if v:
                cap = int(v)
                break
    except Exception:
        pass
    return tm, tn, cap


def _gemm_bn_mish_kernel(x_ref, w_ref, b_ref, o_ref):
    """One grid step: TM output pixels x TN output channels.

    x_ref: (1, TM, KKC)  shifted-stacked (im2col'd) activations, bf16
    w_ref: (KKC, TN)     BN-scale-folded weights, bf16
    b_ref: (1, TN)       folded BN bias, f32
    o_ref: (1, TM, TN)   output tile
    """
    z = jnp.dot(x_ref[0], w_ref[...], preferred_element_type=jnp.float32) + b_ref[...]
    # Mish: z * tanh(softplus(z)) with PyTorch's softplus threshold=20.
    # tanh(log1p(e)) == (w - 1) / (w + 1) with w = (1 + e)^2  ->  1 EUP exp + 1 EUP recip.
    # approx recip relerr ~2^-12, well inside the bf16-matmul noise floor.
    e = jnp.exp(jnp.minimum(z, 20.0))
    wq = (1.0 + e) * (1.0 + e)
    tsp = (wq - 1.0) * pl.reciprocal(wq + 1.0, approx=True)
    o_ref[0] = jnp.where(z > 20.0, z, z * tsp).astype(o_ref.dtype)


def conv_bn_activation(x, weight, gamma, beta, running_mean, running_var,
                       *, stride=1, eps=1e-5, out_dtype=jnp.float32):
    """x: [N, C, H, W] float32 (NCHW, like PyTorch). Returns [N, O, Ho, Wo] out_dtype."""
    N, C, H, W = x.shape
    O, _, K, _ = weight.shape
    S = stride
    P = (K - 1) // 2
    Ho = (H + 2 * P - K) // S + 1
    Wo = (W + 2 * P - K) // S + 1
    KKC = K * K * C

    TM_pref, TN_pref, vmem_cap = _tpu_tile_defaults()

    # ---- glue: NHWC, pad, then fold the K*K taps AND the stride into the channel axis
    #      (one XLA pass over the input) -> [N, Ho*Wo (padded to TM), K*K*C] bf16 ----
    xp = jnp.transpose(x, (0, 2, 3, 1))
    xp = jnp.pad(xp, ((0, 0), (P, P), (P, P), (0, 0)))
    taps = []
    for kh in range(K):
        for kw in range(K):
            taps.append(xp[:,
                           kh:kh + S * (Ho - 1) + 1:S,
                           kw:kw + S * (Wo - 1) + 1:S, :])
    cols = jnp.concatenate(taps, axis=-1).reshape(N, Ho * Wo, KKC)

    TM = min(TM_pref, _round_up(Ho * Wo, 8))      # M tile: multiple of 8, <= 128/256
    Mp = _round_up(Ho * Wo, TM)                   # ragged tail padded, not masked
    if Mp != Ho * Wo:
        cols = jnp.pad(cols, ((0, 0), (0, Mp - Ho * Wo), (0, 0)))
    cols = cols.astype(jnp.bfloat16)

    # ---- fold eval-mode BN into weight scale + bias; [O,C,K,K] -> [K*K*C, Opad] ----
    inv_std = 1.0 / jnp.sqrt(running_var.astype(jnp.float32) + eps)
    scale = gamma.astype(jnp.float32) * inv_std                       # [O]
    bias = beta.astype(jnp.float32) - running_mean.astype(jnp.float32) * scale

    Opad = _round_up(O, 128)                                          # lane-dense output
    TN = TN_pref if Opad % TN_pref == 0 else 128

    wf = weight.astype(jnp.float32) * scale[:, None, None, None]      # [O, C, K, K]
    wf = wf.transpose(2, 3, 1, 0).reshape(KKC, O)                     # [(kh,kw,c), O]
    if Opad != O:
        wf = jnp.pad(wf, ((0, 0), (0, Opad - O)))
        bias = jnp.pad(bias, (0, Opad - O))
    wf = wf.astype(jnp.bfloat16)
    bias2 = bias.reshape(1, Opad).astype(jnp.float32)

    n_m = Mp // TM
    n_o = Opad // TN

    # explicit VMEM budget: double-buffered blocks + slack, generation-aware cap
    out_itemsize = jnp.dtype(out_dtype).itemsize
    blk = TM * KKC * 2 + KKC * TN * 2 + TN * 4 + TM * TN * out_itemsize
    est = 2 * blk + (2 << 20)
    vmem_limit = int(min(int(0.85 * vmem_cap), max(32 * 2 ** 20, 2 * est)))

    out = pl.pallas_call(
        _gemm_bn_mish_kernel,
        out_shape=jax.ShapeDtypeStruct((N, Mp, Opad), out_dtype),
        # o-tile axis innermost so the activation block stays VMEM-resident across it
        grid=(N, n_m, n_o),
        in_specs=[
            pl.BlockSpec((1, TM, KKC), lambda n, i, j: (n, i, 0)),
            pl.BlockSpec((KKC, TN), lambda n, i, j: (0, j)),
            pl.BlockSpec((1, TN), lambda n, i, j: (0, j)),
        ],
        out_specs=pl.BlockSpec((1, TM, TN), lambda n, i, j: (n, i, j)),
        compiler_params=pltpu.CompilerParams(
            dimension_semantics=("parallel", "parallel", "parallel"),
            vmem_limit_bytes=vmem_limit),
    )(cols, wf, bias2)

    # ---- glue: drop padding, back to NCHW (PyTorch layout) ----
    out = out[:, :Ho * Wo, :O].reshape(N, Ho, Wo, O)
    return out.transpose(0, 3, 1, 2)


def _reference(x, weight, gamma, beta, running_mean, running_var, *, stride=1, eps=1e-5):
    K = weight.shape[-1]
    P = (K - 1) // 2
    z = jax.lax.conv_general_dilated(
        x, weight, window_strides=(stride, stride), padding=[(P, P), (P, P)],
        dimension_numbers=("NCHW", "OIHW", "NCHW"),
        precision=jax.lax.Precision.HIGHEST)
    inv_std = 1.0 / jnp.sqrt(running_var + eps)
    z = z * (gamma * inv_std)[None, :, None, None] + \
        (beta - running_mean * gamma * inv_std)[None, :, None, None]
    sp = jnp.where(z > 20.0, z, jnp.log1p(jnp.exp(jnp.minimum(z, 20.0))))
    return z * jnp.tanh(sp)


if __name__ == "__main__":
    # Conv_Bn_Activation(in_channels=4, out_channels=8, kernel_size=3, stride=1,
    #                    activation='mish', bn=True, bias=False)
    N, C, H, W = 2, 4, 16, 16
    O, K = 8, 3

    key = jax.random.PRNGKey(0)
    kx, kw, kg, kb, km, kv = jax.random.split(key, 6)

    x = jax.random.normal(kx, (N, C, H, W), dtype=jnp.float32)
    weight = 0.1 * jax.random.normal(kw, (O, C, K, K), dtype=jnp.float32)
    gamma = 1.0 + 0.1 * jax.random.normal(kg, (O,), dtype=jnp.float32)
    beta = 0.1 * jax.random.normal(kb, (O,), dtype=jnp.float32)
    running_mean = 0.1 * jax.random.normal(km, (O,), dtype=jnp.float32)
    running_var = 0.5 + 0.5 * jnp.abs(jax.random.normal(kv, (O,), dtype=jnp.float32))

    # stride=1 (matches the module defaults used in the model)
    fn1 = jax.jit(functools.partial(conv_bn_activation, stride=1))
    y1 = jax.block_until_ready(fn1(x, weight, gamma, beta, running_mean, running_var))
    y1_ref = _reference(x, weight, gamma, beta, running_mean, running_var, stride=1)
    assert y1.shape == (N, O, H, W)
    assert jnp.allclose(y1, y1_ref, atol=2e-2, rtol=2e-2), \
        float(jnp.max(jnp.abs(y1 - y1_ref)))

    # stride=2 downsample path (stride is folded wrapper-side; kernel path is identical)
    fn2 = jax.jit(functools.partial(conv_bn_activation, stride=2))
    y2 = jax.block_until_ready(fn2(x, weight, gamma, beta, running_mean, running_var))
    y2_ref = _reference(x, weight, gamma, beta, running_mean, running_var, stride=2)
    assert y2.shape == (N, O, H // 2, W // 2)
    assert jnp.allclose(y2, y2_ref, atol=2e-2, rtol=2e-2), \
        float(jnp.max(jnp.abs(y2 - y2_ref)))

    print("KERNEL_OK")
</pallas_src>

<mosaic_0001>
module attributes {stable_mosaic.version = 11 : i64} {
  func.func @_gemm_bn_mish_kernel(%arg0: i32, %arg1: i32, %arg2: i32, %arg3: memref<1x256x36xbf16, #tpu.memory_space<vmem>>, %arg4: memref<36x128xbf16, #tpu.memory_space<vmem>>, %arg5: memref<1x128xf32, #tpu.memory_space<vmem>>, %arg6: memref<1x256x128xf32, #tpu.memory_space<vmem>>) attributes {dimension_semantics = [#tpu.dimension_semantics<parallel>, #tpu.dimension_semantics<parallel>, #tpu.dimension_semantics<parallel>], iteration_bounds = array<i64: 2, 1, 1>, scalar_prefetch = 0 : i64, scratch_operands = 0 : i64, tpu.core_type = #tpu.core_type<tc>, window_params = [{transform_indices = @transform_0, window_bounds = array<i64: 1, 256, 36>}, {transform_indices = @transform_1, window_bounds = array<i64: 36, 128>}, {transform_indices = @transform_2, window_bounds = array<i64: 1, 128>}, {transform_indices = @transform_3, window_bounds = array<i64: 1, 256, 128>}]} {
    %c0 = arith.constant 0 : index
    %c0_0 = arith.constant 0 : index
    %c0_1 = arith.constant 0 : index
    %0 = vector.load %arg3[%c0, %c0_0, %c0_1] : memref<1x256x36xbf16, #tpu.memory_space<vmem>>, vector<1x256x36xbf16>
    %1 = vector.shape_cast %0 : vector<1x256x36xbf16> to vector<256x36xbf16>
    %c0_2 = arith.constant 0 : index
    %c0_3 = arith.constant 0 : index
    %2 = vector.load %arg4[%c0_2, %c0_3] : memref<36x128xbf16, #tpu.memory_space<vmem>>, vector<36x128xbf16>
    %cst = arith.constant dense<0.000000e+00> : vector<256x128xf32>
    %3 = tpu.matmul %1, %2, %cst {dimension_numbers = #tpu.dot_dimension_numbers<[1], [0], [0], [1], [0, 0, 1, 1], [], []>} : vector<256x36xbf16>, vector<36x128xbf16>, vector<256x128xf32> -> vector<256x128xf32>
    %c0_4 = arith.constant 0 : index
    %c0_5 = arith.constant 0 : index
    %4 = vector.load %arg5[%c0_4, %c0_5] : memref<1x128xf32, #tpu.memory_space<vmem>>, vector<1x128xf32>
    %5 = vector.broadcast %4 : vector<1x128xf32> to vector<256x128xf32>
    %6 = arith.addf %3, %5 : vector<256x128xf32>
    %cst_6 = arith.constant 2.000000e+01 : f32
    %7 = vector.broadcast %cst_6 : f32 to vector<256x128xf32>
    %8 = arith.minimumf %6, %7 : vector<256x128xf32>
    %9 = math.exp %8 : vector<256x128xf32>
    %cst_7 = arith.constant 1.000000e+00 : f32
    %10 = vector.broadcast %cst_7 : f32 to vector<256x128xf32>
    %11 = arith.addf %10, %9 : vector<256x128xf32>
    %cst_8 = arith.constant 1.000000e+00 : f32
    %12 = vector.broadcast %cst_8 : f32 to vector<256x128xf32>
    %13 = arith.addf %12, %9 : vector<256x128xf32>
    %14 = arith.mulf %11, %13 : vector<256x128xf32>
    %cst_9 = arith.constant 1.000000e+00 : f32
    %15 = vector.broadcast %cst_9 : f32 to vector<256x128xf32>
    %16 = arith.subf %14, %15 : vector<256x128xf32>
    %cst_10 = arith.constant 1.000000e+00 : f32
    %17 = vector.broadcast %cst_10 : f32 to vector<256x128xf32>
    %18 = arith.addf %14, %17 : vector<256x128xf32>
    %19 = tpu.reciprocal %18 {approx = true} : vector<256x128xf32> -> vector<256x128xf32>
    %20 = arith.mulf %16, %19 : vector<256x128xf32>
    %cst_11 = arith.constant 2.000000e+01 : f32
    %21 = vector.broadcast %cst_11 : f32 to vector<256x128xf32>
    %22 = arith.cmpf ogt, %6, %21 : vector<256x128xf32>
    %23 = arith.mulf %6, %20 : vector<256x128xf32>
    %24 = arith.select %22, %6, %23 : vector<256x128xi1>, vector<256x128xf32>
    %c0_12 = arith.constant 0 : index
    %c0_13 = arith.constant 0 : index
    %c0_14 = arith.constant 0 : index
    %25 = vector.load %arg6[%c0_12, %c0_13, %c0_14] : memref<1x256x128xf32, #tpu.memory_space<vmem>>, vector<1x256x128xf32>
    %26 = vector.shape_cast %25 : vector<1x256x128xf32> to vector<256x128xf32>
    %27 = vector.shape_cast %24 : vector<256x128xf32> to vector<1x256x128xf32>
    tpu.vector_store %arg6[%c0_12, %c0_13, %c0_14], %27 {strides = array<i32>} : memref<1x256x128xf32, #tpu.memory_space<vmem>>, vector<1x256x128xf32>,
    return
  }
  func.func @transform_0(%arg0: i32, %arg1: i32, %arg2: i32) -> (i32, i32, i32) {
    %c0_i32 = arith.constant 0 : i32
    %c0_i32_0 = arith.constant 0 : i32
    return %arg0, %arg1, %c0_i32 : i32, i32, i32
  }
  func.func @transform_1(%arg0: i32, %arg1: i32, %arg2: i32) -> (i32, i32) {
    %c0_i32 = arith.constant 0 : i32
    %c0_i32_0 = arith.constant 0 : i32
    return %c0_i32, %arg2 : i32, i32
  }
  func.func @transform_2(%arg0: i32, %arg1: i32, %arg2: i32) -> (i32, i32) {
    %c0_i32 = arith.constant 0 : i32
    %c0_i32_0 = arith.constant 0 : i32
    return %c0_i32, %arg2 : i32, i32
  }
  func.func @transform_3(%arg0: i32, %arg1: i32, %arg2: i32) -> (i32, i32, i32) {
    %c0_i32 = arith.constant 0 : i32
    return %arg0, %arg1, %arg2 : i32, i32, i32
  }
}

</mosaic_0001>

<bundles_post_ra>
// kernel: conv_bn_activation.1
= control target key start
LH: loop header
LB: loop body
LE: loop exit
PB: predicated region body
PF: predicated region fallthrough
CT: control target
= control target key end

     0   :  { %s1516_s12 = smov 0   ;;  %s1518_s13 = smov 0   ;;  %s1975_s0 = inlined_call_operand.vmem [shape: bf16[2,256,36], index: 0, kind: input, shape index: {}]   ;;  %s1976_s1 = inlined_call_operand.vmem [shape: bf16[36,128], index: 1, kind: input, shape index: {}]   ;;  %s1977_s2 = inlined_call_operand.vmem [shape: f32[1,128], index: 2, kind: input, shape index: {}]   ;;  %s1978_s3 = inlined_call_operand.vmem [shape: f32[2,256,128], index: 3, kind: output, shape index: {}]  }
   0x1   :  { %s1520_s14 = smov 0  }
   0x2 LB: > { %s32_s15 = sadd.s32 1, %s1490_s13  ;;  %p1159_p0 = scmp.ge.s32.totalorder %s1494_s14, 1  ;;  %s1494_s14 = sphi %s1520_s14, %s13_s14   ;;  %s1490_s13 = sphi %s1518_s13, %s1980_s13   ;;  %s1486_s12 = sphi %s1516_s12, %s1979_s12  }
   0x3   : > { %p34_p1 = scmp.ge.s32.totalorder %s32_s15, 2  ;;  %p184_p2 = scmp.lt.s32.totalorder %s1494_s14, 3 }
   0x5   : > { %s1982_s15 = smov (%p34_p1, %s32_s15), 0  ;;  %p185_p3 = pnand %p1159_p0, %p184_p2 }
   0x6   : > { %v1325_v0 = vld [vmem:[%s1976_s1] sm:$0xff] (!%p185_p3)   ;;  %v1326_v1 = vld [vmem:[%s1976_s1 + $0x8] sm:$0xff] (!%p185_p3)   ;;  %p227_p4 = scmp.lt.s32.totalorder (!%p185_p3), %s1486_s12, 1  ;;  %v1327_v2 = vld [vmem:[%s1976_s1 + $0x10] ss:$0 sps:$4 sm:$0x33] (!%p185_p3)  }
   0x7   : > { %188 = sbr.rel (%p185_p3) target bundleno = 358 (0x166), region = 32  ;;  %1255 = vmatprep.subr.bf16.mxu0 (!%p185_p3), %v1325_v0  ;;  %1293 = vmatprep.subr.bf16.mxu1 (!%p185_p3), %v1325_v0  ;;  %vm445_vm0 = vcmask (!%p185_p3), 1041408   ;;  %vm396_vm1 = vcmask (!%p185_p3), 293888   ;;  %v1586_v20 = vld [vmem:[%s1977_s2] ss:$0 sm:$0xff] (!%p185_p3) }
   0x8   : > { %1256 = vmatpush3.bf16.msra.mxu0 (!%p185_p3), %v1325_v0  ;;  %1296 = vmatpush3.bf16.msra.mxu1 (!%p185_p3), %v1325_v0  ;;  %v447_v4 = vsel (!%p185_p3), %vm445_vm0, %v1327_v2, 0 }
   0x9   : > { %1257 = vmatprep.subr.bf16.mxu0 (!%p185_p3), %v1326_v1  ;;  %1294 = vmatprep.subr.bf16.mxu1 (!%p185_p3), %v1326_v1 }
   0xc   : > { %1258 = vmatpush3.bf16.msra.mxu0 (!%p185_p3), %v1326_v1  ;;  %1297 = vmatpush3.bf16.msra.mxu1 (!%p185_p3), %v1326_v1 }
   0xd   : > { %1299 = vmatprep.subr.msk.bf16.mxu0 (!%p185_p3), %vm445_vm0, %v1327_v2  ;;  %1300 = vmatprep.subr.msk.bf16.mxu1 (!%p185_p3), %vm445_vm0, %v1327_v2 }
   0xe   : > { %s1984_s12 = smov (!%p227_p4, %s1486_s12), 1 }
   0xf   : > { %s1234_s22 = sshll.u32 %s1984_s12, 7  ;;  %s1235_s28 = sshll.u32 %s1984_s12, 8 }
  0x10   : > { %s1549_s25 = scalar_lea.vmem %s1975_s0, %s1234_s22  ;;  %1260 = vmatpush3.bf16.msra.mxu0 %v447_v4  ;;  %1298 = vmatpush3.bf16.msra.mxu1 %v447_v4  ;;  %s1711_s4 = scalar_lea.vmem %s1978_s3, %s1235_s28 }
  0x11   : > { %v1328_v3 = vld [vmem:[%s1549_s25] sm:$0xff]   ;;  %v1330_v6 = vld [vmem:[%s1549_s25 + $0x8] sm:$0xff]   ;;  %v1332_v8 = vld [vmem:[%s1549_s25 + $0x10] sm:$0xff]  }
  0x12   : > { %v1329_v5 = vld [vmem:[%s1549_s25 + $0x40] sm:$0xff]   ;;  %1261 = vmatprep.mubr.msk.bf16.mxu0 %vm396_vm1, %v1328_v3  ;;  %v1331_v7 = vld [vmem:[%s1549_s25 + $0x48] sm:$0xff]   ;;  %v1333_v9 = vld [vmem:[%s1549_s25 + $0x50] sm:$0xff]  }
  0x13   : > { %1277 = vmatprep.mubr.msk.bf16.mxu1 %vm396_vm1, %v1329_v5  ;;  %1262 = vmatmul.mubr.msk.bf16.vlgmr.msra.gmra.mrb[0].mxu0 %vm396_vm1, %v1330_v6  ;;  %v1334_v10 = vld [vmem:[%s1549_s25 + $0x18] sm:$0xff]   ;;  %v1336_v12 = vld [vmem:[%s1549_s25 + $0x20] sm:$0xff]   ;;  %v1338_v14 = vld [vmem:[%s1549_s25 + $0x28] sm:$0xff]  }
  0x14   : > { %1278 = vmatmul.mubr.msk.bf16.vlgmr.msra.gmra.mrb[0].mxu1 %vm396_vm1, %v1331_v7  ;;  %1265 = vmatprep.mubr.msk.bf16.mxu0 %vm396_vm1, %v1332_v8  ;;  %v1335_v11 = vld [vmem:[%s1549_s25 + $0x58] sm:$0xff]   ;;  %v1337_v13 = vld [vmem:[%s1549_s25 + $0x60] sm:$0xff]   ;;  %v1339_v15 = vld [vmem:[%s1549_s25 + $0x68] sm:$0xff]  }
  0x15   : > { %1281 = vmatprep.mubr.msk.bf16.mxu1 %vm396_vm1, %v1333_v9  ;;  %v1340_v16 = vld [vmem:[%s1549_s25 + $0x30] sm:$0xff]   ;;  %v1342_v18 = vld [vmem:[%s1549_s25 + $0x38] sm:$0xff]  }
  0x16   : > { %v1341_v17 = vld [vmem:[%s1549_s25 + $0x70] sm:$0xff]   ;;  %v1343_v19 = vld [vmem:[%s1549_s25 + $0x78] sm:$0xff]  }
  0x1b   : > { %1266 = vmatmul.mubr.msk.bf16.gmra.mrb[4].mxu0 %vm396_vm1, %v1334_v10 }
  0x1c   : > { %1282 = vmatmul.mubr.msk.bf16.gmra.mrb[4].mxu1 %vm396_vm1, %v1335_v11  ;;  %1269 = vmatprep.mubr.msk.bf16.mxu0 %vm396_vm1, %v1336_v12 }
  0x1d   : > { %1285 = vmatprep.mubr.msk.bf16.mxu1 %vm396_vm1, %v1337_v13 }
  0x23   : > { %1270 = vmatmul.mubr.msk.bf16.gmra.mrb[8].mxu0 %vm396_vm1, %v1338_v14 }
  0x24   : > { %1286 = vmatmul.mubr.msk.bf16.gmra.mrb[8].mxu1 %vm396_vm1, %v1339_v15  ;;  %1273 = vmatprep.mubr.msk.bf16.mxu0 %vm396_vm1, %v1340_v16 }
  0x25   : > { %1289 = vmatprep.mubr.msk.bf16.mxu1 %vm396_vm1, %v1341_v17 }
  0x2b   : > { %1274 = vmatmul.mubr.msk.bf16.gmra.mrb[12].mxu0 %vm396_vm1, %v1342_v18 }
  0x2c   : > { %1290 = vmatmul.mubr.msk.bf16.gmra.mrb[12].mxu1 %vm396_vm1, %v1343_v19 }
  0xe6   : > { %v1263_v21 = vpop.f32.mrb[0].mxu0 }
  0xe7   : > { %v1279_v22 = vpop.f32.mrb[0].mxu1  ;;  %v1589_v23 = vadd.f32 %v1263_v21, %v1586_v20  ;;  %v483_v25 = vpop.f32.mrb[1].mxu0 }
  0xe8   : > { %v1592_v24 = vadd.f32 %v1279_v22, %v1586_v20  ;;  %v547_v26 = vpop.f32.mrb[1].mxu1  ;;  %v1595_v27 = vadd.f32 %v1586_v20, %v483_v25  ;;  %v1264_v29 = vpop.f32.mrb[2].mxu0 }
  0xe9   : > { %v1598_v28 = vadd.f32 %v1586_v20, %v547_v26  ;;  %v1280_v30 = vpop.f32.mrb[2].mxu1  ;;  %v612_v31 = vmin.f32 %v1589_v23, 20.0  ;;  %v486_v33 = vpop.f32.mrb[3].mxu0  ;;  %v1605_v39 = vadd.f32 %v1264_v29, %v1586_v20  ;;  %vm900_vm2 = vcmp.gt.f32.partialorder %v1589_v23, 20.0 }
  0xea   : > { %v628_v32 = vmin.f32 %v1592_v24, 20.0  ;;  %v550_v34 = vpop.f32.mrb[3].mxu1  ;;  %v610_v35 = vmin.f32 %v1595_v27, 20.0  ;;  %v1608_v40 = vadd.f32 %v1280_v30, %v1586_v20  ;;  %v1611_v43 = vadd.f32 %v1586_v20, %v486_v33 }
  0xeb   : > { %v626_v36 = vmin.f32 %v1598_v28, 20.0  ;;  %v646_v37 = vmul.f32 1.442695, %v612_v31  ;;  %v1614_v44 = vadd.f32 %v1586_v20, %v550_v34  ;;  %v613_v45 = vmin.f32 %v1605_v39, 20.0 }
  0xec   : > { %v678_v38 = vmul.f32 1.442695, %v628_v32  ;;  %v642_v41 = vmul.f32 1.442695, %v610_v35  ;;  %v629_v46 = vmin.f32 %v1608_v40, 20.0  ;;  %v611_v47 = vmin.f32 %v1611_v43, 20.0 }
  0xed   : > { %v674_v42 = vmul.f32 1.442695, %v626_v36  ;;  %1344 = vpow2.f32 %v646_v37  ;;  %v648_v50 = vmul.f32 1.442695, %v613_v45  ;;  %v627_v52 = vmin.f32 %v1614_v44, 20.0 }
  0xee   : > { %1346 = vpow2.f32 %v678_v38  ;;  %v1267_v48 = vpop.f32.mrb[4].mxu0  ;;  %v680_v51 = vmul.f32 1.442695, %v629_v46  ;;  %v644_v54 = vmul.f32 1.442695, %v611_v47  ;;  %vm916_vm3 = vcmp.gt.f32.partialorder %v1592_v24, 20.0 }
  0xef   : > { %v1283_v49 = vpop.f32.mrb[4].mxu1  ;;  %1348 = vpow2.f32 %v642_v41  ;;  %v499_v53 = vpop.f32.mrb[5].mxu0  ;;  %v1621_v55 = vadd.f32 %v1267_v48, %v1586_v20  ;;  %v676_v58 = vmul.f32 1.442695, %v627_v52  ;;  %vm898_vm4 = vcmp.gt.f32.partialorder %v1595_v27, 20.0 }
  0xf0   : > { %1350 = vpow2.f32 %v674_v42  ;;  %v563_v56 = vpop.f32.mrb[5].mxu1  ;;  %v1268_v57 = vpop.f32.mrb[6].mxu0  ;;  %v1624_v59 = vadd.f32 %v1283_v49, %v1586_v20  ;;  %v1627_v60 = vadd.f32 %v1586_v20, %v499_v53  ;;  %vm914_vm5 = vcmp.gt.f32.partialorder %v1598_v28, 20.0 }
  0xf1   : > { %1352 = vpow2.f32 %v648_v50  ;;  %v1284_v61 = vpop.f32.mrb[6].mxu1  ;;  %v502_v62 = vpop.f32.mrb[7].mxu0  ;;  %v616_v63 = vmin.f32 %v1621_v55, 20.0  ;;  %v1631_v0 = vadd.f32 %v1586_v20, %v563_v56  ;;  %v1637_v8 = vadd.f32 %v1268_v57, %v1586_v20 }
  0xf2   : > { %1354 = vpow2.f32 %v680_v51  ;;  %v566_v1 = vpop.f32.mrb[7].mxu1  ;;  %v632_v2 = vmin.f32 %v1624_v59, 20.0  ;;  %v614_v3 = vmin.f32 %v1627_v60, 20.0  ;;  %v1645_v14 = vadd.f32 %v1284_v61, %v1586_v20 }
  0xf3   : > { %1356 = vpow2.f32 %v644_v54  ;;  %v654_v4 = vmul.f32 1.442695, %v616_v63  ;;  %v630_v5 = vmin.f32 %v1631_v0, 20.0  ;;  %v617_v13 = vmin.f32 %v1637_v8, 20.0 }
  0xf4   : > { %1358 = vpow2.f32 %v676_v58  ;;  %v686_v6 = vmul.f32 1.442695, %v632_v2  ;;  %v650_v7 = vmul.f32 1.442695, %v614_v3  ;;  %v1652_v19 = vadd.f32 %v1586_v20, %v502_v62 }
  0xf5   : > { %1360 = vpow2.f32 %v654_v4  ;;  %v682_v9 = vmul.f32 1.442695, %v630_v5  ;;  %v656_v29 = vmul.f32 1.442695, %v617_v13  ;;  %v633_v38 = vmin.f32 %v1645_v14, 20.0 }
  0xf6   : > { %v1639_v10 = vpop.f32.mrb[8].mxu0  ;;  %1362 = vpow2.f32 %v686_v6  ;;  %v615_v47 = vmin.f32 %v1652_v19, 20.0  ;;  %v1665_v56 = vadd.f32 %v1586_v20, %v566_v1  ;;  %vm901_vm6 = vcmp.gt.f32.partialorder %v1605_v39, 20.0 }
  0xf7   : > { %v1641_v11 = vpop.f32.mrb[8].mxu1  ;;  %v1345_v12 = vpop.eup %1344  ;;  %1364 = vpow2.f32 %v650_v7  ;;  %v1671_v63 = vmul.f32 1.442695, %v633_v38  ;;  %vm917_vm7 = vcmp.gt.f32.partialorder %v1608_v40, 20.0  ;;  %vm899_vm8 = vcmp.gt.f32.partialorder %v1611_v43, 20.0 }
  0xf8   : > { %v1647_v15 = vpop.f32.mrb[9].mxu0  ;;  %v1649_v16 = vpop.f32.mrb[9].mxu1  ;;  %v708_v18 = vadd.f32 1.0, %v1345_v12  ;;  %1366 = vpow2.f32 %v682_v9  ;;  %v1677_v7 = vmul.f32 1.442695, %v615_v47  ;;  %vm915_vm9 = vcmp.gt.f32.partialorder %v1614_v44, 20.0 }
  0xf9   : > { %v1347_v17 = vpop.eup %1346  ;;  %v1654_v21 = vpop.f32.mrb[10].mxu0  ;;  %1368 = vpow2.f32 %v656_v29  ;;  %vm904_vm10 = vcmp.gt.f32.partialorder %v1621_v55, 20.0  ;;  %vm920_vm11 = vcmp.gt.f32.partialorder %v1624_v59, 20.0  ;;  %vm902_vm12 = vcmp.gt.f32.partialorder %v1627_v60, 20.0 }
  0xfa   : > { %v1656_v22 = vpop.f32.mrb[10].mxu1  ;;  %v1349_v25 = vpop.eup %1348  ;;  %v724_v26 = vadd.f32 1.0, %v1347_v17  ;;  %v740_v33 = vmul.f32 %v708_v18, %v708_v18  ;;  %vm918_vm13 = vcmp.gt.f32.partialorder %v1631_v0, 20.0  ;;  %vm905_vm14 = vcmp.gt.f32.partialorder %v1637_v8, 20.0 }
  0xfb   : > { %v1658_v30 = vpop.f32.mrb[11].mxu0  ;;  %v1660_v31 = vpop.f32.mrb[11].mxu1  ;;  %v706_v34 = vadd.f32 1.0, %v1349_v25  ;;  %vm921_vm15 = vcmp.gt.f32.partialorder %v1645_v14, 20.0  ;;  %vm903_vm0 = vcmp.gt.f32.partialorder %v1652_v19, 20.0  ;;  %vm919_vm1 = vcmp.gt.f32.partialorder %v1665_v56, 20.0 }
  0xfc   : > { %v1351_v32 = vpop.eup %1350  ;;  %v756_v36 = vmul.f32 %v724_v26, %v724_v26  ;;  %v804_v42 = vadd.f32 1.0, %v740_v33  ;;  %v1202_v13 = vadd.f32 -1.0, %v740_v33 }
  0xfd   : > { %v1353_v35 = vpop.eup %1352  ;;  %v722_v37 = vadd.f32 1.0, %v1351_v32  ;;  %v738_v45 = vmul.f32 %v706_v34, %v706_v34 }
  0xfe   : > { %v1355_v41 = vpop.eup %1354  ;;  %v709_v46 = vadd.f32 1.0, %v1353_v35  ;;  %v820_v49 = vadd.f32 1.0, %v756_v36  ;;  %1370 = vrcp.f32 %v804_v42  ;;  %v1667_v57 = vpop.f32.mrb[12].mxu0  ;;  %v1218_v38 = vadd.f32 -1.0, %v756_v36 }
  0xff   : > { %v1357_v48 = vpop.eup %1356  ;;  %v754_v50 = vmul.f32 %v722_v37, %v722_v37  ;;  %v725_v51 = vadd.f32 1.0, %v1355_v41  ;;  %v802_v53 = vadd.f32 1.0, %v738_v45  ;;  %v1669_v58 = vpop.f32.mrb[12].mxu1  ;;  %v1200_v33 = vadd.f32 -1.0, %v738_v45 }
 0x100   : > { %v1359_v52 = vpop.eup %1358  ;;  %v741_v54 = vmul.f32 %v709_v46, %v709_v46  ;;  %1372 = vrcp.f32 %v820_v49  ;;  %v1673_v2 = vpop.f32.mrb[13].mxu0  ;;  %v707_v6 = vadd.f32 1.0, %v1357_v48 }
 0x101   : > { %v818_v61 = vadd.f32 1.0, %v754_v50  ;;  %v757_v62 = vmul.f32 %v725_v51, %v725_v51  ;;  %v1675_v3 = vpop.f32.mrb[13].mxu1  ;;  %v1361_v4 = vpop.eup %1360  ;;  %1374 = vrcp.f32 %v802_v53  ;;  %v723_v18 = vadd.f32 1.0, %v1359_v52 }
 0x102   : > { %v805_v5 = vadd.f32 1.0, %v741_v54  ;;  %v1679_v1 = vpop.f32.mrb[14].mxu0  ;;  %v1681_v9 = vpop.f32.mrb[14].mxu1  ;;  %v739_v32 = vmul.f32 %v707_v6, %v707_v6  ;;  %v712_v34 = vadd.f32 1.0, %v1361_v4  ;;  %v1216_v51 = vadd.f32 -1.0, %v754_v50 }
 0x103   : > { %v1363_v12 = vpop.eup %1362  ;;  %1376 = vrcp.f32 %v818_v61  ;;  %v821_v17 = vadd.f32 1.0, %v757_v62  ;;  %v1683_v25 = vpop.f32.mrb[15].mxu0  ;;  %v755_v41 = vmul.f32 %v723_v18, %v723_v18  ;;  %v1203_v36 = vadd.f32 -1.0, %v741_v54 }
 0x104   : > { %v1685_v26 = vpop.f32.mrb[15].mxu1  ;;  %v1365_v29 = vpop.eup %1364  ;;  %1378 = vrcp.f32 %v805_v5  ;;  %v728_v35 = vadd.f32 1.0, %v1363_v12  ;;  %v803_v46 = vadd.f32 1.0, %v739_v32  ;;  %v744_v47 = vmul.f32 %v712_v34, %v712_v34 }
 0x105   : > { %v1367_v37 = vpop.eup %1366  ;;  %1380 = vrcp.f32 %v821_v17  ;;  %v710_v42 = vadd.f32 1.0, %v1365_v29  ;;  %v819_v52 = vadd.f32 1.0, %v755_v41  ;;  %v1219_v4 = vadd.f32 -1.0, %v757_v62 }
 0x106   : > { %v1688_v48 = vmul.f32 %v728_v35, %v728_v35  ;;  %v1369_v49 = vpop.eup %1368  ;;  %v726_v61 = vadd.f32 1.0, %v1367_v37  ;;  %1382 = vrcp.f32 %v803_v46  ;;  %v808_v5 = vadd.f32 1.0, %v744_v47 }
 0x107   : > { %v1691_v53 = vmul.f32 %v710_v42, %v710_v42  ;;  %1384 = vrcp.f32 %v819_v52  ;;  %v631_v12 = vmin.f32 %v1665_v56, 20.0  ;;  %v1201_v17 = vadd.f32 -1.0, %v739_v32 }
 0x108   : > { %v824_v45 = vadd.f32 1.0, %v1688_v48  ;;  %v1371_v50 = vpop.eup %1370  ;;  %1386 = vrcp.f32 %v808_v5  ;;  %v1700_v18 = vmul.f32 %v726_v61, %v726_v61  ;;  %v713_v54 = vadd.f32 1.0, %v1369_v49 }
 0x109   : > { %v806_v6 = vadd.f32 1.0, %v1691_v53  ;;  %v868_v29 = vmul.f32 %v1371_v50, %v1202_v13  ;;  %v1217_v34 = vadd.f32 -1.0, %v755_v41  ;;  %v1705_v35 = vadd.f32 %v1639_v10, %v1586_v20 }
 0x10a   : > { %v1373_v62 = vpop.eup %1372  ;;  %1388 = vrcp.f32 %v824_v45  ;;  %v1206_v46 = vadd.f32 -1.0, %v744_v47  ;;  %v822_v32 = vadd.f32 1.0, %v1700_v18  ;;  %v1714_v49 = vmul.f32 %v713_v54, %v713_v54 }
 0x10b   : > { %v1375_v37 = vpop.eup %1374  ;;  %v884_v42 = vmul.f32 %v1373_v62, %v1218_v38  ;;  %1390 = vrcp.f32 %v806_v6  ;;  %v932_v13 = vmul.f32 %v868_v29, %v1589_v23  ;;  %v620_v61 = vmin.f32 %v1705_v35, 20.0 }
 0x10c   : > { %v866_v41 = vmul.f32 %v1375_v37, %v1200_v33  ;;  %1392 = vpow2.f32 %v1671_v63  ;;  %v684_v63 = vmul.f32 1.442695, %v631_v12  ;;  %v1222_v37 = vadd.f32 -1.0, %v1688_v48 }
 0x10d   : > { %v1377_v52 = vpop.eup %1376  ;;  %v948_v38 = vmul.f32 %v884_v42, %v1592_v24  ;;  %1394 = vrcp.f32 %v822_v32  ;;  %v964_v45 = vsel %vm900_vm2, %v1589_v23, %v932_v13  ;;  %v809_v23 = vadd.f32 1.0, %v1714_v49 }
 0x10e   : > { %v1379_v10 = vpop.eup %1378  ;;  %v882_v47 = vmul.f32 %v1377_v52, %v1216_v51  ;;  %v930_v33 = vmul.f32 %v866_v41, %v1595_v27  ;;  %996 = vst [vmem:[%s1711_s4 + $0x10] sm:$0xff] %v964_v45  ;;  %1396 = vpow2.f32 %v1677_v7  ;;  %v1752_v32 = vadd.f32 %v1641_v11, %v1586_v20 }
 0x10f   : > { %v1381_v5 = vpop.eup %1380  ;;  %v869_v6 = vmul.f32 %v1379_v10, %v1203_v36  ;;  %v980_v51 = vsel %vm916_vm3, %v1592_v24, %v948_v38  ;;  %v662_v24 = vmul.f32 1.442695, %v620_v61  ;;  %1398 = vrcp.f32 %v809_v23 }
 0x110   : > { %v946_v50 = vmul.f32 %v882_v47, %v1598_v28  ;;  %v885_v54 = vmul.f32 %v1381_v5, %v1219_v4  ;;  %1012 = vst [vmem:[%s1711_s4 + $0x90] sm:$0xff] %v980_v51  ;;  %v962_v36 = vsel %vm898_vm4, %v1595_v27, %v930_v33  ;;  %v1383_v62 = vpop.eup %1382  ;;  %1400 = vpow2.f32 %v684_v63 }
 0x111   : > { %v933_v12 = vmul.f32 %v869_v6, %v1605_v39  ;;  %994 = vst [vmem:[%s1711_s4] sm:$0xff] %v962_v36  ;;  %v1385_v27 = vpop.eup %1384  ;;  %v867_v42 = vmul.f32 %v1383_v62, %v1201_v17  ;;  %1402 = vpow2.f32 %v662_v24  ;;  %v1760_v13 = vadd.f32 %v1586_v20, %v1647_v15 }
 0x112   : > { %v978_v4 = vsel %vm914_vm5, %v1598_v28, %v946_v50  ;;  %v949_v29 = vmul.f32 %v885_v54, %v1608_v40  ;;  %v1387_v28 = vpop.eup %1386  ;;  %v883_v52 = vmul.f32 %v1385_v27, %v1217_v34  ;;  %v1204_v11 = vadd.f32 -1.0, %v1691_v53 }
 0x113   : > { %1010 = vst [vmem:[%s1711_s4 + $0x80] sm:$0xff] %v978_v4  ;;  %v965_v7 = vsel %vm901_vm6, %v1605_v39, %v933_v12  ;;  %v931_v39 = vmul.f32 %v867_v42, %v1611_v43  ;;  %v872_v17 = vmul.f32 %v1387_v28, %v1206_v46  ;;  %v636_v10 = vmin.f32 %v1752_v32, 20.0 }
 0x114   : > { %997 = vst [vmem:[%s1711_s4 + $0x18] sm:$0xff] %v965_v7  ;;  %v981_v48 = vsel %vm917_vm7, %v1608_v40, %v949_v29  ;;  %v1389_v41 = vpop.eup %1388  ;;  %v947_v40 = vmul.f32 %v883_v52, %v1614_v44  ;;  %v1220_v47 = vadd.f32 -1.0, %v1700_v18  ;;  %v618_v15 = vmin.f32 %v1760_v13, 20.0 }
 0x115   : > { %1013 = vst [vmem:[%s1711_s4 + $0x98] sm:$0xff] %v981_v48  ;;  %v1391_v38 = vpop.eup %1390  ;;  %v888_v34 = vmul.f32 %v1389_v41, %v1222_v37  ;;  %v963_v5 = vsel %vm899_vm8, %v1611_v43, %v931_v39  ;;  %v936_v46 = vmul.f32 %v872_v17, %v1621_v55  ;;  %v694_v45 = vmul.f32 1.442695, %v636_v10 }
 0x116   : > { %v1393_v61 = vpop.eup %1392  ;;  %v870_v53 = vmul.f32 %v1391_v38, %v1204_v11  ;;  %995 = vst [vmem:[%s1711_s4 + $0x8] sm:$0xff] %v963_v5  ;;  %v979_v6 = vsel %vm915_vm9, %v1614_v44, %v947_v40  ;;  %v658_v51 = vmul.f32 1.442695, %v618_v15  ;;  %v1789_v36 = vadd.f32 %v1586_v20, %v1649_v16 }
 0x117   : > { %v1395_v33 = vpop.eup %1394  ;;  %v952_v18 = vmul.f32 %v888_v34, %v1624_v59  ;;  %v729_v63 = vadd.f32 1.0, %v1393_v61  ;;  %1011 = vst [vmem:[%s1711_s4 + $0x88] sm:$0xff] %v979_v6  ;;  %v968_v43 = vsel %vm904_vm10, %v1621_v55, %v936_v46  ;;  %1404 = vpow2.f32 %v694_v45 }
 0x118   : > { %v934_v50 = vmul.f32 %v870_v53, %v1627_v60  ;;  %v886_v54 = vmul.f32 %v1395_v33, %v1220_v47  ;;  %1000 = vst [vmem:[%s1711_s4 + $0x30] sm:$0xff] %v968_v43  ;;  %1406 = vpow2.f32 %v658_v51  ;;  %v1397_v12 = vpop.eup %1396  ;;  %v1207_v62 = vadd.f32 -1.0, %v1714_v49 }
 0x119   : > { %v984_v23 = vsel %vm920_vm11, %v1624_v59, %v952_v18  ;;  %v761_v44 = vmul.f32 %v729_v63, %v729_v63  ;;  %v1799_v59 = vadd.f32 %v1654_v21, %v1586_v20  ;;  %v1399_v4 = vpop.eup %1398  ;;  %v711_v29 = vadd.f32 1.0, %v1397_v12 }
 0x11a   : > { %1016 = vst [vmem:[%s1711_s4 + $0xb0] sm:$0xff] %v984_v23  ;;  %v966_v55 = vsel %vm902_vm12, %v1627_v60, %v934_v50  ;;  %v950_v24 = vmul.f32 %v886_v54, %v1631_v0  ;;  %v634_v37 = vmin.f32 %v1789_v36, 20.0  ;;  %v1401_v27 = vpop.eup %1400  ;;  %v873_v7 = vmul.f32 %v1399_v4, %v1207_v62 }
 0x11b   : > { %998 = vst [vmem:[%s1711_s4 + $0x20] sm:$0xff] %v966_v55  ;;  %v825_v16 = vadd.f32 1.0, %v761_v44  ;;  %v621_v42 = vmin.f32 %v1799_v59, 20.0  ;;  %v1808_v49 = vadd.f32 %v1656_v22, %v1586_v20  ;;  %v1403_v21 = vpop.eup %1402  ;;  %v743_v28 = vmul.f32 %v711_v29, %v711_v29 }
 0x11c   : > { %v982_v60 = vsel %vm918_vm13, %v1631_v0, %v950_v24  ;;  %v727_v48 = vadd.f32 1.0, %v1401_v27  ;;  %v690_v52 = vmul.f32 1.442695, %v634_v37  ;;  %v937_v41 = vmul.f32 %v873_v7, %v1637_v8 }
 0x11d   : > { %1014 = vst [vmem:[%s1711_s4 + $0xa0] sm:$0xff] %v982_v60  ;;  %1408 = vrcp.f32 %v825_v16  ;;  %v716_v39 = vadd.f32 1.0, %v1403_v21  ;;  %v664_v17 = vmul.f32 1.442695, %v621_v42  ;;  %v807_v0 = vadd.f32 1.0, %v743_v28 }
 0x11e   : > { %v759_v11 = vmul.f32 %v727_v48, %v727_v48  ;;  %1410 = vpow2.f32 %v690_v52  ;;  %v969_v10 = vsel %vm905_vm14, %v1637_v8, %v937_v41  ;;  %v637_v38 = vmin.f32 %v1808_v49, 20.0 }
 0x11f   : > { %v748_v22 = vmul.f32 %v716_v39, %v716_v39  ;;  %1412 = vpow2.f32 %v664_v17  ;;  %1001 = vst [vmem:[%s1711_s4 + $0x38] sm:$0xff] %v969_v10  ;;  %v1818_v61 = vadd.f32 %v1586_v20, %v1658_v30  ;;  %v1822_v8 = vadd.f32 %v1586_v20, %v1660_v31 }
 0x120   : > { %1414 = vrcp.f32 %v807_v0  ;;  %v823_v40 = vadd.f32 1.0, %v759_v11  ;;  %v696_v15 = vmul.f32 1.442695, %v637_v38  ;;  %v1826_v53 = vadd.f32 %v1667_v57, %v1586_v20 }
 0x121   : > { %v1405_v34 = vpop.eup %1404  ;;  %v812_v47 = vadd.f32 1.0, %v748_v22  ;;  %v619_v33 = vmin.f32 %v1818_v61, 20.0  ;;  %v635_v30 = vmin.f32 %v1822_v8, 20.0  ;;  %v1223_v18 = vadd.f32 -1.0, %v761_v44 }
 0x122   : > { %v1407_v5 = vpop.eup %1406  ;;  %1416 = vrcp.f32 %v823_v40  ;;  %v732_v46 = vadd.f32 1.0, %v1405_v34  ;;  %v624_v31 = vmin.f32 %v1826_v53, 20.0  ;;  %v1837_v54 = vadd.f32 %v1669_v58, %v1586_v20 }
 0x123   : > { %1418 = vrcp.f32 %v812_v47  ;;  %v714_v45 = vadd.f32 1.0, %v1407_v5  ;;  %v660_v51 = vmul.f32 1.442695, %v619_v33  ;;  %v692_v50 = vmul.f32 1.442695, %v635_v30 }
 0x124   : > { %v764_v6 = vmul.f32 %v732_v46, %v732_v46  ;;  %1420 = vpow2.f32 %v696_v15  ;;  %v1205_v12 = vadd.f32 -1.0, %v743_v28  ;;  %v1221_v24 = vadd.f32 -1.0, %v759_v11 }
 0x125   : > { %v1831_v63 = vmul.f32 %v714_v45, %v714_v45  ;;  %1422 = vpow2.f32 %v660_v51  ;;  %v670_v62 = vmul.f32 1.442695, %v624_v31  ;;  %v640_v4 = vmin.f32 %v1837_v54, 20.0 }
 0x126   : > { %v828_v57 = vadd.f32 1.0, %v764_v6  ;;  %v1845_v37 = vadd.f32 %v1586_v20, %v1673_v2  ;;  %v1210_v60 = vadd.f32 -1.0, %v748_v22  ;;  %v1856_v39 = vadd.f32 %v1586_v20, %v1675_v3 }
 0x127   : > { %v1409_v43 = vpop.eup %1408  ;;  %v810_v55 = vadd.f32 1.0, %v1831_v63  ;;  %v702_v42 = vmul.f32 1.442695, %v640_v4  ;;  %vm908_vm2 = vcmp.gt.f32.partialorder %v1705_v35, 20.0  ;;  %vm924_vm3 = vcmp.gt.f32.partialorder %v1752_v32, 20.0 }
 0x128   : > { %v889_v23 = vmul.f32 %v1409_v43, %v1223_v18  ;;  %v1411_v44 = vpop.eup %1410  ;;  %1424 = vrcp.f32 %v828_v57  ;;  %v622_v2 = vmin.f32 %v1845_v37, 20.0  ;;  %v1226_v5 = vadd.f32 -1.0, %v764_v6 }
 0x129   : > { %v1413_v16 = vpop.eup %1412  ;;  %1426 = vrcp.f32 %v810_v55  ;;  %v730_v58 = vadd.f32 1.0, %v1411_v44  ;;  %v638_v46 = vmin.f32 %v1856_v39, 20.0  ;;  %v1208_v51 = vadd.f32 -1.0, %v1831_v63 }
 0x12a   : > { %v953_v29 = vmul.f32 %v889_v23, %v1645_v14  ;;  %v1415_v27 = vpop.eup %1414  ;;  %v717_v7 = vadd.f32 1.0, %v1413_v16  ;;  %1428 = vpow2.f32 %v692_v50  ;;  %v666_v40 = vmul.f32 1.442695, %v622_v2 }
 0x12b   : > { %v871_v28 = vmul.f32 %v1415_v27, %v1205_v12  ;;  %v762_v48 = vmul.f32 %v730_v58, %v730_v58  ;;  %1430 = vpow2.f32 %v670_v62  ;;  %v698_v43 = vmul.f32 1.442695, %v638_v46 }
 0x12c   : > { %v985_v21 = vsel %vm921_vm15, %v1645_v14, %v953_v29  ;;  %v1417_v52 = vpop.eup %1416  ;;  %v1851_v41 = vmul.f32 %v717_v7, %v717_v7  ;;  %1432 = vpow2.f32 %v702_v42  ;;  %vm906_vm4 = vcmp.gt.f32.partialorder %v1760_v13, 20.0 }
 0x12d   : > { %1017 = vst [vmem:[%s1711_s4 + $0xb8] sm:$0xff] %v985_v21  ;;  %v1419_v17 = vpop.eup %1418  ;;  %v935_v0 = vmul.f32 %v871_v28, %v1652_v19  ;;  %v887_v11 = vmul.f32 %v1417_v52, %v1221_v24  ;;  %v826_v14 = vadd.f32 1.0, %v762_v48  ;;  %v1224_v29 = vadd.f32 -1.0, %v762_v48 }
 0x12e   : > { %v1421_v10 = vpop.eup %1420  ;;  %v876_v22 = vmul.f32 %v1419_v17, %v1210_v60  ;;  %v813_v38 = vadd.f32 1.0, %v1851_v41  ;;  %v1211_v48 = vadd.f32 -1.0, %v1851_v41  ;;  %vm922_vm5 = vcmp.gt.f32.partialorder %v1789_v36, 20.0 }
 0x12f   : > { %v967_v3 = vsel %vm903_vm0, %v1652_v19, %v935_v0  ;;  %v951_v34 = vmul.f32 %v887_v11, %v1665_v56  ;;  %1434 = vrcp.f32 %v826_v14  ;;  %v733_v47 = vadd.f32 1.0, %v1421_v10  ;;  %v1423_v45 = vpop.eup %1422 }
 0x130   : > { %999 = vst [vmem:[%s1711_s4 + $0x28] sm:$0xff] %v967_v3  ;;  %v940_v15 = vmul.f32 %v876_v22, %v1705_v35  ;;  %1436 = vrcp.f32 %v813_v38  ;;  %v1874_v19 = vadd.f32 %v1679_v1, %v1586_v20  ;;  %v715_v31 = vadd.f32 1.0, %v1423_v45 }
 0x131   : > { %v983_v33 = vsel %vm919_vm1, %v1665_v56, %v951_v34  ;;  %v765_v30 = vmul.f32 %v733_v47, %v733_v47  ;;  %1438 = vpow2.f32 %v666_v40  ;;  %vm909_vm6 = vcmp.gt.f32.partialorder %v1799_v59, 20.0 }
 0x132   : > { %v1425_v18 = vpop.eup %1424  ;;  %1015 = vst [vmem:[%s1711_s4 + $0xa8] sm:$0xff] %v983_v33  ;;  %v972_v6 = vsel %vm908_vm2, %v1705_v35, %v940_v15  ;;  %v625_v23 = vmin.f32 %v1874_v19, 20.0  ;;  %v747_v55 = vmul.f32 %v715_v31, %v715_v31  ;;  %1440 = vpow2.f32 %v698_v43 }
 0x133   : > { %v1427_v57 = vpop.eup %1426  ;;  %1004 = vst [vmem:[%s1711_s4 + $0x50] sm:$0xff] %v972_v6  ;;  %v892_v50 = vmul.f32 %v1425_v18, %v1226_v5  ;;  %v829_v56 = vadd.f32 1.0, %v765_v30  ;;  %v1886_v35 = vadd.f32 %v1681_v9, %v1586_v20  ;;  %v1905_v41 = vadd.f32 %v1586_v20, %v1683_v25 }
 0x134   : > { %v1429_v1 = vpop.eup %1428  ;;  %v874_v12 = vmul.f32 %v1427_v57, %v1208_v51  ;;  %v672_v62 = vmul.f32 1.442695, %v625_v23  ;;  %v811_v58 = vadd.f32 1.0, %v747_v55  ;;  %v1227_v34 = vadd.f32 -1.0, %v765_v30 }
 0x135   : > { %v1431_v63 = vpop.eup %1430  ;;  %v956_v44 = vmul.f32 %v892_v50, %v1752_v32  ;;  %1442 = vrcp.f32 %v829_v56  ;;  %v731_v24 = vadd.f32 1.0, %v1429_v1  ;;  %v641_v28 = vmin.f32 %v1886_v35, 20.0 }
 0x136   : > { %v1433_v4 = vpop.eup %1432  ;;  %v938_v16 = vmul.f32 %v874_v12, %v1760_v13  ;;  %v720_v27 = vadd.f32 1.0, %v1431_v63  ;;  %1444 = vpow2.f32 %v672_v62  ;;  %v1910_v47 = vadd.f32 %v1586_v20, %v1685_v26 }
 0x137   : > { %v988_v60 = vsel %vm924_vm3, %v1752_v32, %v956_v44  ;;  %v763_v7 = vmul.f32 %v731_v24, %v731_v24  ;;  %v736_v9 = vadd.f32 1.0, %v1433_v4  ;;  %1446 = vrcp.f32 %v811_v58 }
 0x138   : > { %1020 = vst [vmem:[%s1711_s4 + $0xd0] sm:$0xff] %v988_v60  ;;  %v970_v42 = vsel %vm906_vm4, %v1760_v13, %v938_v16  ;;  %v752_v21 = vmul.f32 %v720_v27, %v720_v27  ;;  %v704_v14 = vmul.f32 1.442695, %v641_v28  ;;  %v623_v45 = vmin.f32 %v1905_v41, 20.0 }
 0x139   : > { %v1435_v52 = vpop.eup %1434  ;;  %1002 = vst [vmem:[%s1711_s4 + $0x40] sm:$0xff] %v970_v42  ;;  %v827_v2 = vadd.f32 1.0, %v763_v7  ;;  %v768_v17 = vmul.f32 %v736_v9, %v736_v9  ;;  %v639_v18 = vmin.f32 %v1910_v47, 20.0  ;;  %v1209_v31 = vadd.f32 -1.0, %v747_v55 }
 0x13a   : > { %v1437_v0 = vpop.eup %1436  ;;  %v890_v32 = vmul.f32 %v1435_v52, %v1224_v29  ;;  %v816_v11 = vadd.f32 1.0, %v752_v21  ;;  %v668_v6 = vmul.f32 1.442695, %v623_v45  ;;  %vm925_vm7 = vcmp.gt.f32.partialorder %v1808_v49, 20.0 }
 0x13b   : > { %v1439_v10 = vpop.eup %1438  ;;  %v877_v22 = vmul.f32 %v1437_v0, %v1211_v48  ;;  %1448 = vrcp.f32 %v827_v2  ;;  %v832_v13 = vadd.f32 1.0, %v768_v17  ;;  %v700_v43 = vmul.f32 1.442695, %v639_v18 }
 0x13c   : > { %v954_v38 = vmul.f32 %v890_v32, %v1789_v36  ;;  %1450 = vrcp.f32 %v816_v11  ;;  %v718_v40 = vadd.f32 1.0, %v1439_v10  ;;  %v1441_v15 = vpop.eup %1440  ;;  %v1225_v12 = vadd.f32 -1.0, %v763_v7 }
 0x13d   : > { %v941_v3 = vmul.f32 %v877_v22, %v1799_v59  ;;  %1452 = vrcp.f32 %v832_v13  ;;  %v734_v30 = vadd.f32 1.0, %v1441_v15  ;;  %v1214_v24 = vadd.f32 -1.0, %v752_v21 }
 0x13e   : > { %v986_v5 = vsel %vm922_vm5, %v1789_v36, %v954_v38  ;;  %v750_v46 = vmul.f32 %v718_v40, %v718_v40  ;;  %1454 = vpow2.f32 %v704_v14  ;;  %vm907_vm8 = vcmp.gt.f32.partialorder %v1818_v61, 20.0 }
 0x13f   : > { %v1443_v33 = vpop.eup %1442  ;;  %1018 = vst [vmem:[%s1711_s4 + $0xc0] sm:$0xff] %v986_v5  ;;  %v973_v25 = vsel %vm909_vm6, %v1799_v59, %v941_v3  ;;  %v766_v36 = vmul.f32 %v734_v30, %v734_v30  ;;  %v1230_v16 = vadd.f32 -1.0, %v768_v17  ;;  %vm923_vm9 = vcmp.gt.f32.partialorder %v1822_v8, 20.0 }
 0x140   : > { %1005 = vst [vmem:[%s1711_s4 + $0x58] sm:$0xff] %v973_v25  ;;  %v893_v20 = vmul.f32 %v1443_v33, %v1227_v34  ;;  %v814_v26 = vadd.f32 1.0, %v750_v46  ;;  %v1445_v51 = vpop.eup %1444  ;;  %vm912_vm10 = vcmp.gt.f32.partialorder %v1826_v53, 20.0  ;;  %vm928_vm11 = vcmp.gt.f32.partialorder %v1837_v54, 20.0 }
 0x141   : > { %v1447_v57 = vpop.eup %1446  ;;  %v721_v56 = vadd.f32 1.0, %v1445_v51  ;;  %v830_v23 = vadd.f32 1.0, %v766_v36  ;;  %v1212_v48 = vadd.f32 -1.0, %v750_v46  ;;  %v1228_v10 = vadd.f32 -1.0, %v766_v36 }
 0x142   : > { %v957_v50 = vmul.f32 %v893_v20, %v1808_v49  ;;  %1456 = vrcp.f32 %v814_v26  ;;  %v875_v59 = vmul.f32 %v1447_v57, %v1209_v31  ;;  %vm910_vm12 = vcmp.gt.f32.partialorder %v1845_v37, 20.0 }
 0x143   : > { %1458 = vpow2.f32 %v668_v6  ;;  %v753_v63 = vmul.f32 %v721_v56, %v721_v56  ;;  %vm926_vm13 = vcmp.gt.f32.partialorder %v1856_v39, 20.0  ;;  %vm913_vm14 = vcmp.gt.f32.partialorder %v1874_v19, 20.0 }
 0x144   : > { %v989_v1 = vsel %vm925_vm7, %v1808_v49, %v957_v50  ;;  %1460 = vpow2.f32 %v700_v43  ;;  %v939_v44 = vmul.f32 %v875_v59, %v1818_v61  ;;  %vm929_vm15 = vcmp.gt.f32.partialorder %v1886_v35, 20.0 }
 0x145   : > { %v1449_v55 = vpop.eup %1448  ;;  %1021 = vst [vmem:[%s1711_s4 + $0xd8] sm:$0xff] %v989_v1  ;;  %1462 = vrcp.f32 %v830_v23  ;;  %v817_v29 = vadd.f32 1.0, %v753_v63  ;;  %v1215_v34 = vadd.f32 -1.0, %v753_v63  ;;  %vm911_vm0 = vcmp.gt.f32.partialorder %v1905_v41, 20.0 }
 0x146   : > { %v1451_v62 = vpop.eup %1450  ;;  %v891_v4 = vmul.f32 %v1449_v55, %v1225_v12  ;;  %v971_v49 = vsel %vm907_vm8, %v1818_v61, %v939_v44  ;;  %vm927_vm1 = vcmp.gt.f32.partialorder %v1910_v47, 20.0 }
 0x147   : > { %v1453_v58 = vpop.eup %1452  ;;  %v880_v27 = vmul.f32 %v1451_v62, %v1214_v24  ;;  %1003 = vst [vmem:[%s1711_s4 + $0x48] sm:$0xff] %v971_v49  ;;  %1464 = vrcp.f32 %v817_v29 }
 0x148   : > { %v1455_v60 = vpop.eup %1454  ;;  %v955_v7 = vmul.f32 %v891_v4, %v1822_v8  ;;  %v896_v9 = vmul.f32 %v1453_v58, %v1230_v16 }
 0x149   : > { %v944_v42 = vmul.f32 %v880_v27, %v1826_v53  ;;  %v737_v21 = vadd.f32 1.0, %v1455_v60 }
 0x14a   : > { %v987_v28 = vsel %vm923_vm9, %v1822_v8, %v955_v7  ;;  %v960_v61 = vmul.f32 %v896_v9, %v1837_v54 }
 0x14b   : > { %1019 = vst [vmem:[%s1711_s4 + $0xc8] sm:$0xff] %v987_v28  ;;  %v976_v52 = vsel %vm912_vm10, %v1826_v53, %v944_v42  ;;  %v769_v2 = vmul.f32 %v737_v21, %v737_v21 }
 0x14c   : > { %v1457_v17 = vpop.eup %1456  ;;  %1008 = vst [vmem:[%s1711_s4 + $0x70] sm:$0xff] %v976_v52  ;;  %v992_v0 = vsel %vm928_vm11, %v1837_v54, %v960_v61 }
 0x14d   : > { %v1459_v32 = vpop.eup %1458  ;;  %1024 = vst [vmem:[%s1711_s4 + $0xf0] sm:$0xff] %v992_v0  ;;  %v878_v11 = vmul.f32 %v1457_v17, %v1212_v48  ;;  %v833_v8 = vadd.f32 1.0, %v769_v2  ;;  %v1231_v20 = vadd.f32 -1.0, %v769_v2 }
 0x14e   : > { %v1461_v14 = vpop.eup %1460  ;;  %v719_v22 = vadd.f32 1.0, %v1459_v32 }
 0x14f   : > { %v1463_v13 = vpop.eup %1462  ;;  %v942_v38 = vmul.f32 %v878_v11, %v1845_v37  ;;  %1466 = vrcp.f32 %v833_v8  ;;  %v735_v53 = vadd.f32 1.0, %v1461_v14 }
 0x150   : > { %v894_v40 = vmul.f32 %v1463_v13, %v1228_v10  ;;  %v751_v3 = vmul.f32 %v719_v22, %v719_v22 }
 0x151   : > { %v974_v54 = vsel %vm910_vm12, %v1845_v37, %v942_v38  ;;  %v767_v15 = vmul.f32 %v735_v53, %v735_v53  ;;  %v1465_v5 = vpop.eup %1464 }
 0x152   : > { %1006 = vst [vmem:[%s1711_s4 + $0x60] sm:$0xff] %v974_v54  ;;  %v958_v46 = vmul.f32 %v894_v40, %v1856_v39  ;;  %v815_v45 = vadd.f32 1.0, %v751_v3  ;;  %v881_v33 = vmul.f32 %v1465_v5, %v1215_v34 }
 0x153   : > { %v831_v25 = vadd.f32 1.0, %v767_v15  ;;  %v1229_v43 = vadd.f32 -1.0, %v767_v15 }
 0x154   : > { %v990_v30 = vsel %vm926_vm13, %v1856_v39, %v958_v46  ;;  %1468 = vrcp.f32 %v815_v45  ;;  %v945_v18 = vmul.f32 %v881_v33, %v1874_v19  ;;  %v1213_v39 = vadd.f32 -1.0, %v751_v3 }
 0x155   : > { %1022 = vst [vmem:[%s1711_s4 + $0xe0] sm:$0xff] %v990_v30  ;;  %1470 = vrcp.f32 %v831_v25 }
 0x156   : > { %v977_v37 = vsel %vm913_vm14, %v1874_v19, %v945_v18 }
 0x157   : > { %1009 = vst [vmem:[%s1711_s4 + $0x78] sm:$0xff] %v977_v37 }
 0x159   : > { %v1467_v26 = vpop.eup %1466 }
 0x15a   : > { %v897_v6 = vmul.f32 %v1467_v26, %v1231_v20 }
 0x15c   : > { %v961_v51 = vmul.f32 %v897_v6, %v1886_v35 }
 0x15e   : > { %v1469_v31 = vpop.eup %1468  ;;  %v993_v36 = vsel %vm929_vm15, %v1886_v35, %v961_v51 }
 0x15f   : > { %v1471_v57 = vpop.eup %1470  ;;  %1025 = vst [vmem:[%s1711_s4 + $0xf8] sm:$0xff] %v993_v36  ;;  %v879_v50 = vmul.f32 %v1469_v31, %v1213_v39 }
 0x160   : > { %v895_v56 = vmul.f32 %v1471_v57, %v1229_v43 }
 0x161   : > { %v943_v19 = vmul.f32 %v879_v50, %v1905_v41 }
 0x162   : > { %v959_v59 = vmul.f32 %v895_v56, %v1910_v47 }
 0x163   : > { %v975_v23 = vsel %vm911_vm0, %v1905_v41, %v943_v19 }
 0x164   : > { %1007 = vst [vmem:[%s1711_s4 + $0x68] sm:$0xff] %v975_v23  ;;  %v991_v1 = vsel %vm927_vm1, %v1910_v47, %v959_v59 }
 0x165   : > { %1023 = vst [vmem:[%s1711_s4 + $0xe8] sm:$0xff] %v991_v1 }
 0x166 PF: > { %s13_s14 = sadd.s32 1, %s1494_s14   ;;  %s1979_s12 = smov %s1490_s13 }
 0x167   : > { %p10_p5 = scmp.ge.s32.totalorder %s13_s14, 4   ;;  %s1980_s13 = smov %s1982_s15 }
 0x169   :  { %12 = sbr.rel (!%p10_p5) target bundleno = 2 (0x2), region = 68 }

</bundles_post_ra>
